<compile_context>
chip_gen: v7x
topology: tpu7x:2x2x1
jax: 0.10.0
libtpu: 0.0.40
codegen_flags: <defaults>
</compile_context>

<pallas_src>
import jax
import jax.numpy as jnp
from jax import lax
from jax.experimental import pallas as pl
from jax.experimental.pallas import tpu as pltpu


def mlp_kernel(x_ref, w1t_ref, b1_ref, w2t_ref, b2_ref, w3_ref, b3_ref, o_ref):
    """One batch tile of the fused 3-layer MLP in transposed (feature-major)
    orientation so every intermediate / the output is lane-dense along batch.

      h1T = relu(W1^T @ x^T + b1)          : (64, TB)
      h2T = relu(W2^T @ h1T + b2)          : (32, TB)
      yT  = sum_k w3[k] * h2T[k] + b3      : (1,  TB)
    """
    # MXU operands in bf16, f32 accumulation, elementwise math in f32.
    x_b = x_ref[...].astype(jnp.bfloat16)                      # (TB, D)

    # Layer 1: contract over D (rhs dim 1) -> (64, TB).  Same A @ B^T pattern
    # as q @ k^T, so no explicit transpose of the x tile is materialized.
    h1 = lax.dot_general(
        w1t_ref[...], x_b, (((1,), (1,)), ((), ())),
        preferred_element_type=jnp.float32)
    h1 = jnp.maximum(h1 + b1_ref[...], 0.0)                     # (64, TB) f32

    # Layer 2: (32, 64) @ (64, TB) -> (32, TB)
    h2 = jnp.dot(w2t_ref[...], h1.astype(jnp.bfloat16),
                 preferred_element_type=jnp.float32)
    h2 = jnp.maximum(h2 + b2_ref[...], 0.0)                     # (32, TB) f32

    # Layer 3: output width is 1, so use VPU multiply + cross-sublane reduce
    # instead of a lane-sparse (TB, 1) matmul; result is lane-dense (1, TB).
    out = jnp.sum(h2 * w3_ref[...], axis=0, keepdims=True) + b3_ref[...]
    o_ref[...] = out.astype(o_ref.dtype)


def regressor_forward(x, params, *, block_b=512):
    """Fused MLP forward.

    x: [B, input_dim] float32
    params: w1 [D,64], b1 [1,64], w2 [64,32], b2 [1,32], w3 [32,1], b3 [1,1]
    returns: [B, 1] float32
    """
    B, D = x.shape
    n_blocks = pl.cdiv(B, block_b)
    b_pad = n_blocks * block_b
    if b_pad != B:
        x = jnp.pad(x, ((0, b_pad - B), (0, 0)))

    # Kernel-side parameter layout: transposed weights (out, in) in bf16 for the
    # MXU; column biases in f32 so they broadcast over the lane (batch) axis.
    w1t = params["w1"].T.astype(jnp.bfloat16)                  # (64, D)
    w2t = params["w2"].T.astype(jnp.bfloat16)                  # (32, 64)
    w3c = params["w3"].astype(jnp.float32)                     # (32, 1)
    b1c = params["b1"].reshape(-1, 1).astype(jnp.float32)      # (64, 1)
    b2c = params["b2"].reshape(-1, 1).astype(jnp.float32)      # (32, 1)
    b3c = params["b3"].reshape(1, 1).astype(jnp.float32)       # (1, 1)

    def resident(a):
        # Full-array block with constant index_map -> stays VMEM-resident.
        return pl.BlockSpec(a.shape, lambda i: (0,) * a.ndim)

    flops = 2 * b_pad * (D * 64 + 64 * 32 + 32 * 1)
    bytes_accessed = (b_pad * D * 4 + b_pad * 4
                      + (w1t.size + w2t.size) * 2
                      + (w3c.size + b1c.size + b2c.size + b3c.size) * 4)

    out_t = pl.pallas_call(
        mlp_kernel,
        out_shape=jax.ShapeDtypeStruct((1, b_pad), jnp.float32),
        grid_spec=pltpu.PrefetchScalarGridSpec(
            num_scalar_prefetch=0,
            grid=(n_blocks,),
            in_specs=[
                pl.BlockSpec((block_b, D), lambda i: (i, 0)),   # pipelined x tile
                resident(w1t), resident(b1c),
                resident(w2t), resident(b2c),
                resident(w3c), resident(b3c),
            ],
            out_specs=pl.BlockSpec((1, block_b), lambda i: (0, i)),
        ),
        compiler_params=pltpu.CompilerParams(
            dimension_semantics=("parallel",)),
        cost_estimate=pl.CostEstimate(
            flops=flops, transcendentals=0, bytes_accessed=bytes_accessed),
    )(x, w1t, b1c, w2t, b2c, w3c, b3c)

    return out_t[0, :B].reshape(B, 1)


def init_params(key, input_dim):
    """PyTorch-like Linear init: uniform in [-1/sqrt(fan_in), 1/sqrt(fan_in)]."""
    dims = [(input_dim, 64), (64, 32), (32, 1)]
    params = {}
    keys = jax.random.split(key, 2 * len(dims))
    for i, (fan_in, fan_out) in enumerate(dims):
        bound = 1.0 / jnp.sqrt(jnp.asarray(fan_in, jnp.float32))
        params[f"w{i + 1}"] = jax.random.uniform(
            keys[2 * i], (fan_in, fan_out), minval=-bound, maxval=bound,
            dtype=jnp.float32)
        params[f"b{i + 1}"] = jax.random.uniform(
            keys[2 * i + 1], (1, fan_out), minval=-bound, maxval=bound,
            dtype=jnp.float32)
    return params


if __name__ == "__main__":
    key = jax.random.PRNGKey(0)
    k_x, k_p = jax.random.split(key)

    # California housing has 8 features; small deterministic batch.
    batch, input_dim = 16, 8
    x = jax.random.normal(k_x, (batch, input_dim), dtype=jnp.float32)
    params = init_params(k_p, input_dim)

    y = jax.block_until_ready(regressor_forward(x, params, block_b=256))

    # Reference in plain JAX with matching bf16 matmul operands / f32 accumulate.
    w1b = params["w1"].astype(jnp.bfloat16)
    w2b = params["w2"].astype(jnp.bfloat16)
    h1 = jnp.maximum(
        jnp.dot(x.astype(jnp.bfloat16), w1b,
                preferred_element_type=jnp.float32) + params["b1"], 0.0)
    h2 = jnp.maximum(
        jnp.dot(h1.astype(jnp.bfloat16), w2b,
                preferred_element_type=jnp.float32) + params["b2"], 0.0)
    y_ref = h2 @ params["w3"] + params["b3"]

    assert y.shape == (batch, 1)
    assert jnp.allclose(y, y_ref, atol=1e-2, rtol=1e-2), \
        float(jnp.max(jnp.abs(y - y_ref)))

    print("KERNEL_OK")
</pallas_src>

<mosaic_0001>
module attributes {stable_mosaic.version = 11 : i64} {
  func.func @mlp_kernel(%arg0: i32, %arg1: memref<256x8xf32, #tpu.memory_space<vmem>>, %arg2: memref<64x8xbf16, #tpu.memory_space<vmem>>, %arg3: memref<64x1xf32, #tpu.memory_space<vmem>>, %arg4: memref<32x64xbf16, #tpu.memory_space<vmem>>, %arg5: memref<32x1xf32, #tpu.memory_space<vmem>>, %arg6: memref<32x1xf32, #tpu.memory_space<vmem>>, %arg7: memref<1x1xf32, #tpu.memory_space<vmem>>, %arg8: memref<1x256xf32, #tpu.memory_space<vmem>>) attributes {dimension_semantics = [#tpu.dimension_semantics<parallel>], iteration_bounds = array<i64: 1>, scalar_prefetch = 0 : i64, scratch_operands = 0 : i64, tpu.core_type = #tpu.core_type<tc>, window_params = [{transform_indices = @transform_0, window_bounds = array<i64: 256, 8>}, {pipeline_mode = #tpu.pipeline_mode<synchronous>, transform_indices = @transform_1, window_bounds = array<i64: 64, 8>}, {pipeline_mode = #tpu.pipeline_mode<synchronous>, transform_indices = @transform_2, window_bounds = array<i64: 64, 1>}, {pipeline_mode = #tpu.pipeline_mode<synchronous>, transform_indices = @transform_3, window_bounds = array<i64: 32, 64>}, {pipeline_mode = #tpu.pipeline_mode<synchronous>, transform_indices = @transform_4, window_bounds = array<i64: 32, 1>}, {pipeline_mode = #tpu.pipeline_mode<synchronous>, transform_indices = @transform_5, window_bounds = array<i64: 32, 1>}, {pipeline_mode = #tpu.pipeline_mode<synchronous>, transform_indices = @transform_6, window_bounds = array<i64: 1, 1>}, {transform_indices = @transform_7, window_bounds = array<i64: 1, 256>}]} {
    %c0 = arith.constant 0 : index
    %c0_0 = arith.constant 0 : index
    %0 = vector.load %arg1[%c0, %c0_0] : memref<256x8xf32, #tpu.memory_space<vmem>>, vector<256x8xf32>
    %1 = arith.truncf %0 : vector<256x8xf32> to vector<256x8xbf16>
    %c0_1 = arith.constant 0 : index
    %c0_2 = arith.constant 0 : index
    %2 = vector.load %arg2[%c0_1, %c0_2] : memref<64x8xbf16, #tpu.memory_space<vmem>>, vector<64x8xbf16>
    %cst = arith.constant dense<0.000000e+00> : vector<64x256xf32>
    %3 = tpu.matmul %2, %1, %cst {dimension_numbers = #tpu.dot_dimension_numbers<[1], [1], [0], [0], [0, 0, 1, 0], [], []>} : vector<64x8xbf16>, vector<256x8xbf16>, vector<64x256xf32> -> vector<64x256xf32>
    %c0_3 = arith.constant 0 : index
    %c0_4 = arith.constant 0 : index
    %4 = vector.load %arg3[%c0_3, %c0_4] : memref<64x1xf32, #tpu.memory_space<vmem>>, vector<64x1xf32>
    %5 = vector.broadcast %4 : vector<64x1xf32> to vector<64x256xf32>
    %6 = arith.addf %3, %5 : vector<64x256xf32>
    %cst_5 = arith.constant 0.000000e+00 : f32
    %7 = vector.broadcast %cst_5 : f32 to vector<64x256xf32>
    %8 = arith.maximumf %6, %7 : vector<64x256xf32>
    %c0_6 = arith.constant 0 : index
    %c0_7 = arith.constant 0 : index
    %9 = vector.load %arg4[%c0_6, %c0_7] : memref<32x64xbf16, #tpu.memory_space<vmem>>, vector<32x64xbf16>
    %10 = arith.truncf %8 : vector<64x256xf32> to vector<64x256xbf16>
    %cst_8 = arith.constant dense<0.000000e+00> : vector<32x256xf32>
    %11 = tpu.matmul %9, %10, %cst_8 {dimension_numbers = #tpu.dot_dimension_numbers<[1], [0], [0], [1], [0, 0, 1, 1], [], []>} : vector<32x64xbf16>, vector<64x256xbf16>, vector<32x256xf32> -> vector<32x256xf32>
    %c0_9 = arith.constant 0 : index
    %c0_10 = arith.constant 0 : index
    %12 = vector.load %arg5[%c0_9, %c0_10] : memref<32x1xf32, #tpu.memory_space<vmem>>, vector<32x1xf32>
    %13 = vector.broadcast %12 : vector<32x1xf32> to vector<32x256xf32>
    %14 = arith.addf %11, %13 : vector<32x256xf32>
    %cst_11 = arith.constant 0.000000e+00 : f32
    %15 = vector.broadcast %cst_11 : f32 to vector<32x256xf32>
    %16 = arith.maximumf %14, %15 : vector<32x256xf32>
    %c0_12 = arith.constant 0 : index
    %c0_13 = arith.constant 0 : index
    %17 = vector.load %arg6[%c0_12, %c0_13] : memref<32x1xf32, #tpu.memory_space<vmem>>, vector<32x1xf32>
    %18 = vector.broadcast %17 : vector<32x1xf32> to vector<32x256xf32>
    %19 = arith.mulf %16, %18 : vector<32x256xf32>
    %cst_14 = arith.constant dense<0.000000e+00> : vector<256xf32>
    %20 = vector.multi_reduction <add>, %19, %cst_14 [0] : vector<32x256xf32> to vector<256xf32>
    %21 = vector.shape_cast %20 : vector<256xf32> to vector<1x256xf32>
    %c0_15 = arith.constant 0 : index
    %c0_16 = arith.constant 0 : index
    %22 = vector.load %arg7[%c0_15, %c0_16] : memref<1x1xf32, #tpu.memory_space<vmem>>, vector<1x1xf32>
    %23 = vector.broadcast %22 : vector<1x1xf32> to vector<1x256xf32>
    %24 = arith.addf %21, %23 : vector<1x256xf32>
    %c0_17 = arith.constant 0 : index
    %c0_18 = arith.constant 0 : index
    %25 = vector.load %arg8[%c0_17, %c0_18] : memref<1x256xf32, #tpu.memory_space<vmem>>, vector<1x256xf32>
    tpu.vector_store %arg8[%c0_17, %c0_18], %24 {strides = array<i32>} : memref<1x256xf32, #tpu.memory_space<vmem>>, vector<1x256xf32>,
    return
  }
  func.func @transform_0(%arg0: i32) -> (i32, i32) {
    %c0_i32 = arith.constant 0 : i32
    %c0_i32_0 = arith.constant 0 : i32
    return %arg0, %c0_i32 : i32, i32
  }
  func.func @transform_1(%arg0: i32) -> (i32, i32) {
    %c0_i32 = arith.constant 0 : i32
    %c0_i32_0 = arith.constant 0 : i32
    %c0_i32_1 = arith.constant 0 : i32
    return %c0_i32, %c0_i32_0 : i32, i32
  }
  func.func @transform_2(%arg0: i32) -> (i32, i32) {
    %c0_i32 = arith.constant 0 : i32
    %c0_i32_0 = arith.constant 0 : i32
    %c0_i32_1 = arith.constant 0 : i32
    return %c0_i32, %c0_i32_0 : i32, i32
  }
  func.func @transform_3(%arg0: i32) -> (i32, i32) {
    %c0_i32 = arith.constant 0 : i32
    %c0_i32_0 = arith.constant 0 : i32
    %c0_i32_1 = arith.constant 0 : i32
    return %c0_i32, %c0_i32_0 : i32, i32
  }
  func.func @transform_4(%arg0: i32) -> (i32, i32) {
    %c0_i32 = arith.constant 0 : i32
    %c0_i32_0 = arith.constant 0 : i32
    %c0_i32_1 = arith.constant 0 : i32
    return %c0_i32, %c0_i32_0 : i32, i32
  }
  func.func @transform_5(%arg0: i32) -> (i32, i32) {
    %c0_i32 = arith.constant 0 : i32
    %c0_i32_0 = arith.constant 0 : i32
    %c0_i32_1 = arith.constant 0 : i32
    return %c0_i32, %c0_i32_0 : i32, i32
  }
  func.func @transform_6(%arg0: i32) -> (i32, i32) {
    %c0_i32 = arith.constant 0 : i32
    %c0_i32_0 = arith.constant 0 : i32
    %c0_i32_1 = arith.constant 0 : i32
    return %c0_i32, %c0_i32_0 : i32, i32
  }
  func.func @transform_7(%arg0: i32) -> (i32, i32) {
    %c0_i32 = arith.constant 0 : i32
    %c0_i32_0 = arith.constant 0 : i32
    return %c0_i32, %arg0 : i32, i32
  }
}

</mosaic_0001>

<bundles_post_ra>
// kernel: tpu_custom_call.1
= control target key start
LH: loop header
LB: loop body
LE: loop exit
PB: predicated region body
PF: predicated region fallthrough
CT: control target
= control target key end

     0   :  { %s848_s0 = inlined_call_operand.vmem [shape: f32[256,8], index: 0, kind: input, shape index: {}]   ;;  %s849_s1 = inlined_call_operand.vmem [shape: bf16[64,8], index: 1, kind: input, shape index: {}]   ;;  %s850_s2 = inlined_call_operand.vmem [shape: f32[64,1], index: 2, kind: input, shape index: {}]   ;;  %s851_s3 = inlined_call_operand.vmem [shape: bf16[32,64], index: 3, kind: input, shape index: {}]   ;;  %s852_s4 = inlined_call_operand.vmem [shape: f32[32,1], index: 4, kind: input, shape index: {}]   ;;  %s853_s5 = inlined_call_operand.vmem [shape: f32[32,1], index: 5, kind: input, shape index: {}]   ;;  %s854_s6 = inlined_call_operand.<no memory space> [shape: f32[1,1], index: 6, kind: input, shape index: {}]   ;;  %s855_s7 = inlined_call_operand.hbm [shape: f32[1,256], index: 7, kind: output, shape index: {}]  }
   0x1   :  { %v12_v0 = vstv %s854_s6 }
   0x2   :  { %13 = vst [vmem:[#allocation2] sm:$0x1] %v12_v0 }
   0x3   :  { %v46_v1 = vld [vmem:[%s848_s0 + $0x80] sm:$0xff]  ;;  %v47_v2 = vld [vmem:[%s848_s0 + $0x88] sm:$0xff]  ;;  %vm154_vm0 = vcmask 64512   ;;  %v48_v6 = vld [vmem:[%s848_s0 + $0x90] sm:$0xff]  ;;  %v596_v8 = vmov 0  }
   0x4   :  { %v30_v3 = vld [vmem:[%s848_s0] sm:$0xff]  ;;  %v70_v4 = vpack.c.bf16 %v47_v2, %v46_v1  ;;  %v31_v5 = vld [vmem:[%s848_s0 + $0x8] sm:$0xff]  ;;  %v49_v7 = vld [vmem:[%s848_s0 + $0x98] sm:$0xff]  ;;  %564 = vset.pattern.permute.xlu0 %v596_v8  ;;  %565 = vset.pattern.permute.xlu1 %v596_v8 }
   0x5   :  { %v62_v9 = vpack.c.bf16 %v31_v5, %v30_v3  ;;  %v71_v10 = vpack.c.bf16 %v49_v7, %v48_v6  ;;  %389 = vmatprep.mubr.bf16.mxu1 %v596_v8  ;;  %v32_v11 = vld [vmem:[%s848_s0 + $0x10] sm:$0xff]  ;;  %v33_v12 = vld [vmem:[%s848_s0 + $0x18] sm:$0xff]  ;;  %v50_v15 = vld [vmem:[%s848_s0 + $0xa0] sm:$0xff] }
   0x6   :  { %553 = vmatprep.subr.msk.bf16.mxu0 %vm154_vm0, %v70_v4  ;;  %v63_v14 = vpack.c.bf16 %v33_v12, %v32_v11  ;;  %v51_v16 = vld [vmem:[%s848_s0 + $0xa8] sm:$0xff]  ;;  %v34_v19 = vld [vmem:[%s848_s0 + $0x20] sm:$0xff]  ;;  %v52_v24 = vld [vmem:[%s848_s0 + $0xb0] sm:$0xff] }
   0x7   :  { %v168_v13 = vsel %vm154_vm0, %v62_v9, 0  ;;  %v72_v18 = vpack.c.bf16 %v51_v16, %v50_v15  ;;  %v35_v20 = vld [vmem:[%s848_s0 + $0x28] sm:$0xff]  ;;  %v688_v21 = vld [vmem:[%s849_s1] sm:$0xff]   ;;  %v53_v25 = vld [vmem:[%s848_s0 + $0xb8] sm:$0xff] }
   0x8   :  { %530 = vmatpush3.bf16.xpose.msra.mxu0 %v168_v13  ;;  %v171_v17 = vsel %vm154_vm0, %v63_v14, 0  ;;  %545 = vmatprep.mubr.msk.bf16.mxu0 %vm154_vm0, %v688_v21  ;;  %v64_v22 = vpack.c.bf16 %v35_v20, %v34_v19  ;;  %v86_v23 = vld [vmem:[%s850_s2] sm:$0xff]  ;;  %v88_v26 = vld [vmem:[%s850_s2 + $0x10] sm:$0xff]  ;;  %v87_v27 = vld [vmem:[%s850_s2 + $0x8] sm:$0xff]  ;;  %v73_v30 = vpack.c.bf16 %v53_v25, %v52_v24 }
   0x9   :  { %554 = vmatprep.subr.msk.bf16.mxu0 %vm154_vm0, %v71_v10  ;;  %96 = vperm.xlu0 %564, %v86_v23   ;;  %v89_v28 = vld [vmem:[%s850_s2 + $0x18] sm:$0xff]  ;;  %v36_v31 = vld [vmem:[%s848_s0 + $0x30] sm:$0xff]  ;;  %v90_v33 = vld [vmem:[%s850_s2 + $0x20] sm:$0xff] }
   0xa   :  { %106 = vperm.xlu1 %565, %v88_v26   ;;  %v174_v29 = vsel %vm154_vm0, %v64_v22, 0  ;;  %v37_v32 = vld [vmem:[%s848_s0 + $0x38] sm:$0xff]  ;;  %v91_v34 = vld [vmem:[%s850_s2 + $0x28] sm:$0xff] }
   0xd   :  { %101 = vperm.xlu0 %564, %v87_v27  }
   0xe   :  { %111 = vperm.xlu1 %565, %v89_v28  }
  0x10   :  { %532 = vmatpush3.bf16.xpose.msra.mxu0 %v171_v17 }
  0x11   :  { %555 = vmatprep.subr.msk.bf16.mxu0 %vm154_vm0, %v72_v18 }
  0x18   :  { %534 = vmatpush3.bf16.xpose.msra.mxu0 %v174_v29 }
  0x19   :  { %14 = vsyncpa [#allocation4], 0  ;;  %556 = vmatprep.subr.msk.bf16.mxu0 %vm154_vm0, %v73_v30  ;;  %v65_v35 = vpack.c.bf16 %v37_v32, %v36_v31  ;;  %v54_v36 = vld [vmem:[%s848_s0 + $0xc0] sm:$0xff]  ;;  %v55_v37 = vld [vmem:[%s848_s0 + $0xc8] sm:$0xff]  ;;  %116 = vperm.xlu0 %564, %v90_v33   ;;  %vm350_vm1 = vcmask 523264  }
  0x1a   :  { %v92_v38 = vld [vmem:[%s850_s2 + $0x30] sm:$0xff]  ;;  %121 = vperm.xlu1 %565, %v91_v34   ;;  %v93_v39 = vld [vmem:[%s850_s2 + $0x38] sm:$0xff]  ;;  %v74_v41 = vpack.c.bf16 %v55_v37, %v54_v36  ;;  %v38_v42 = vld [vmem:[%s848_s0 + $0x40] sm:$0xff] }
  0x1b   :  { %v177_v40 = vsel %vm154_vm0, %v65_v35, 0  ;;  %v39_v43 = vld [vmem:[%s848_s0 + $0x48] sm:$0xff]  ;;  %v316_v44 = vld [vmem:[%s852_s4] sm:$0xff]  ;;  %v56_v47 = vld [vmem:[%s848_s0 + $0xd0] sm:$0xff] }
  0x1c   :  { %v317_v45 = vld [vmem:[%s852_s4 + $0x8] sm:$0xff]  ;;  %v66_v46 = vpack.c.bf16 %v39_v43, %v38_v42  ;;  %v57_v48 = vld [vmem:[%s848_s0 + $0xd8] sm:$0xff]  ;;  %v318_v49 = vld [vmem:[%s852_s4 + $0x10] sm:$0xff] }
  0x1d   :  { %126 = vperm.xlu0 %564, %v92_v38   ;;  %v319_v50 = vld [vmem:[%s852_s4 + $0x18] sm:$0xff]  ;;  %v75_v52 = vpack.c.bf16 %v57_v48, %v56_v47  ;;  %v40_v53 = vld [vmem:[%s848_s0 + $0x50] sm:$0xff]  ;;  %v418_v55 = vld [vmem:[%s853_s5] sm:$0xff] }
  0x1e   :  { %131 = vperm.xlu1 %565, %v93_v39   ;;  %v180_v51 = vsel %vm154_vm0, %v66_v46, 0  ;;  %v41_v54 = vld [vmem:[%s848_s0 + $0x58] sm:$0xff]  ;;  %v419_v56 = vld [vmem:[%s853_s5 + $0x8] sm:$0xff]  ;;  %v58_v58 = vld [vmem:[%s848_s0 + $0xe0] sm:$0xff] }
  0x1f   :  { %v67_v57 = vpack.c.bf16 %v41_v54, %v40_v53  ;;  %v59_v59 = vld [vmem:[%s848_s0 + $0xe8] sm:$0xff]  ;;  %v420_v60 = vld [vmem:[%s853_s5 + $0x10] sm:$0xff]  ;;  %v421_v61 = vld [vmem:[%s853_s5 + $0x18] sm:$0xff] }
  0x20   :  { %536 = vmatpush3.bf16.xpose.msra.mxu0 %v177_v40  ;;  %v76_v63 = vpack.c.bf16 %v59_v59, %v58_v58  ;;  %v42_v0 = vld [vmem:[%s848_s0 + $0x60] sm:$0xff]  ;;  %v43_v1 = vld [vmem:[%s848_s0 + $0x68] sm:$0xff]  ;;  %v60_v4 = vld [vmem:[%s848_s0 + $0xf0] sm:$0xff] }
  0x21   :  { %557 = vmatprep.subr.msk.bf16.mxu0 %vm154_vm0, %v74_v41  ;;  %322 = vperm.xlu0 %564, %v316_v44   ;;  %v183_v62 = vsel %vm154_vm0, %v67_v57, 0  ;;  %v468_v2 = vld [vmem:[#allocation2] sm:$0x1]  ;;  %v68_v3 = vpack.c.bf16 %v43_v1, %v42_v0  ;;  %v61_v5 = vld [vmem:[%s848_s0 + $0xf8] sm:$0xff]  ;;  %v44_v9 = vld [vmem:[%s848_s0 + $0x70] sm:$0xff] }
  0x22   :  { %327 = vperm.xlu1 %565, %v317_v45   ;;  %v77_v7 = vpack.c.bf16 %v61_v5, %v60_v4  ;;  %v45_v10 = vld [vmem:[%s848_s0 + $0x78] sm:$0xff]  ;;  %v567_v13 = vld [vmem:[%s849_s1 + $0x8] sm:$0xff]   ;;  %v568_v14 = vld [vmem:[%s849_s1 + $0x10] sm:$0xff]  }
  0x23   :  { %v186_v6 = vsel %vm154_vm0, %v68_v3, 0  ;;  %v69_v11 = vpack.c.bf16 %v45_v10, %v44_v9  ;;  %v569_v15 = vld [vmem:[%s849_s1 + $0x18] sm:$0xff]  }
  0x25   :  { %332 = vperm.xlu0 %564, %v318_v49   ;;  %v189_v12 = vsel %vm154_vm0, %v69_v11, 0 }
  0x26   :  { %337 = vperm.xlu1 %565, %v319_v50  }
  0x28   :  { %538 = vmatpush3.bf16.xpose.msra.mxu0 %v180_v51 }
  0x29   :  { %558 = vmatprep.subr.msk.bf16.mxu0 %vm154_vm0, %v75_v52  ;;  %424 = vperm.xlu0 %564, %v418_v55  }
  0x2a   :  { %429 = vperm.xlu1 %565, %v419_v56  }
  0x2d   :  { %434 = vperm.xlu0 %564, %v420_v60  }
  0x2e   :  { %439 = vperm.xlu1 %565, %v421_v61  }
  0x30   :  { %540 = vmatpush3.bf16.xpose.msra.mxu0 %v183_v62 }
  0x31   :  { %559 = vmatprep.subr.msk.bf16.mxu0 %vm154_vm0, %v76_v63  ;;  %471 = vperm.xlu0 %564, %v468_v2  }
  0x38   :  { %542 = vmatpush3.bf16.xpose.msra.mxu0 %v186_v6 }
  0x39   :  { %560 = vmatprep.subr.msk.bf16.mxu0 %vm154_vm0, %v77_v7 }
  0x40   :  { %544 = vmatpush3.bf16.xpose.msra.mxu0 %v189_v12 }
  0x47   :  { %546 = vmatmul.mubr.msk.bf16.vlgmr.msra.gmra.mrb[0].mxu0 %vm154_vm0, %v688_v21 }
  0x48   :  { %547 = vmatprep.mubr.msk.bf16.mxu0 %vm154_vm0, %v567_v13 }
  0x4f   :  { %548 = vmatmul.mubr.msk.bf16.gmra.mrb[4].mxu0 %vm154_vm0, %v567_v13 }
  0x50   :  { %549 = vmatprep.mubr.msk.bf16.mxu0 %vm154_vm0, %v568_v14 }
  0x57   :  { %550 = vmatmul.mubr.msk.bf16.gmra.mrb[8].mxu0 %vm154_vm0, %v568_v14 }
  0x58   :  { %551 = vmatprep.mubr.msk.bf16.mxu0 %vm154_vm0, %v569_v15 }
  0x5f   :  { %552 = vmatmul.mubr.msk.bf16.gmra.mrb[12].mxu0 %vm154_vm0, %v569_v15 }
  0x88   :  { %v97_v16 = vpop.permute.xlu0 %96 }
  0x89   :  { %v107_v25 = vpop.permute.xlu1 %106 }
  0x8c   :  { %v102_v20 = vpop.permute.xlu0 %101 }
  0x8d   :  { %v112_v36 = vpop.permute.xlu1 %111 }
  0x98   :  { %v117_v47 = vpop.permute.xlu0 %116 }
  0x99   :  { %v122_v52 = vpop.permute.xlu1 %121 }
  0x9c   :  { %v127_v63 = vpop.permute.xlu0 %126 }
  0x9d   :  { %v132_v4 = vpop.permute.xlu1 %131 }
 0x11a   :  { %v249_v17 = vpop.f32.mrb[0].mxu0 }
 0x11b   :  { %v250_v18 = vadd.f32 %v249_v17, %v97_v16  ;;  %v251_v19 = vpop.f32.mrb[1].mxu0  ;;  %v570_v17 = vld [vmem:[%s851_s3] sm:$0xff]  }
 0x11c   :  { %v252_v21 = vadd.f32 %v251_v19, %v97_v16  ;;  %v253_v22 = vpop.f32.mrb[2].mxu0  ;;  %v323_v19 = vpop.permute.xlu0 %322 }
 0x11d   :  { %v254_v23 = vadd.f32 %v253_v22, %v102_v20  ;;  %v255_v24 = vpop.f32.mrb[3].mxu0  ;;  %v288_v27 = vmax.f32 %v250_v18, 0.0  ;;  %v571_v18 = vld [vmem:[%s851_s3 + $0x8] sm:$0xff]   ;;  %s598_s3 = smov [#allocation3]  }
 0x11e   :  { %v256_v26 = vadd.f32 %v255_v24, %v102_v20  ;;  %v289_v29 = vmax.f32 %v252_v21, 0.0  ;;  %v328_v20 = vpop.permute.xlu1 %327  ;;  %s509_s8 = sshll.u32 %s598_s3, 4  ;;  %s510_s8 = int_to_ptr.vmem [resolvable:$true] %s509_s8 }
 0x11f   :  { %v290_v28 = vmax.f32 %v254_v23, 0.0  ;;  %s572_s9 = scalar_lea.vmem %s510_s8, 32  ;;  %p577_p1 = scmp.lt.s32.totalorder %s510_s8, %s510_s8 }
 0x120   :  { %v291_v30 = vmax.f32 %v256_v26, 0.0  ;;  %v333_v21 = vpop.permute.xlu0 %332  ;;  %p573_p0 = scmp.ne.s32.totalorder %s510_s8, %s572_s9  ;;  %p578_p2 = scmp.lt.s32.totalorder %s572_s9, %s572_s9 }
 0x121   :  { %v308_v31 = vpack.c.bf16 %v290_v28, %v288_v27 }
 0x122   :  { %v259_v32 = vpop.f32.mrb[4].mxu0  ;;  %v309_v33 = vpack.c.bf16 %v291_v30, %v289_v29  ;;  %v338_v22 = vpop.permute.xlu1 %337  ;;  %p579_p3 = por %p578_p2, %p577_p1 }
 0x123   :  { %v260_v34 = vadd.f32 %v259_v32, %v107_v25  ;;  %v261_v35 = vpop.f32.mrb[5].mxu0 }
 0x124   :  { %v262_v37 = vadd.f32 %v261_v35, %v107_v25  ;;  %v263_v38 = vpop.f32.mrb[6].mxu0  ;;  %357 = vmatprep.subr.bf16.mxu1 %v309_v33  ;;  %v425_v33 = vpop.permute.xlu0 %424  ;;  %p580_p4 = pnand %p579_p3, %p573_p0 }
 0x125   :  { %v264_v39 = vadd.f32 %v263_v38, %v112_v36  ;;  %v265_v40 = vpop.f32.mrb[7].mxu0  ;;  %358 = vmatpush1.bf16.msra.mxu1 %v308_v31  ;;  %v292_v42 = vmax.f32 %v260_v34, 0.0 }
 0x126   :  { %v266_v41 = vadd.f32 %v265_v40, %v112_v36  ;;  %v293_v44 = vmax.f32 %v262_v37, 0.0  ;;  %v430_v34 = vpop.permute.xlu1 %429 }
 0x127   :  { %v294_v43 = vmax.f32 %v264_v39, 0.0 }
 0x128   :  { %v295_v45 = vmax.f32 %v266_v41, 0.0 }
 0x129   :  { %v310_v46 = vpack.c.bf16 %v294_v43, %v292_v42 }
 0x12a   :  { %v311_v48 = vpack.c.bf16 %v295_v45, %v293_v44  ;;  %v269_v49 = vpop.f32.mrb[8].mxu0 }
 0x12b   :  { %v270_v50 = vadd.f32 %v269_v49, %v117_v47  ;;  %v271_v51 = vpop.f32.mrb[9].mxu0 }
 0x12c   :  { %v272_v53 = vadd.f32 %v271_v51, %v117_v47  ;;  %v273_v54 = vpop.f32.mrb[10].mxu0  ;;  %359 = vmatprep.subr.bf16.mxu1 %v311_v48 }
 0x12d   :  { %v274_v55 = vadd.f32 %v273_v54, %v122_v52  ;;  %v275_v56 = vpop.f32.mrb[11].mxu0  ;;  %360 = vmatpush1.bf16.msra.mxu1 %v310_v46  ;;  %v296_v58 = vmax.f32 %v270_v50, 0.0  ;;  %v435_v50 = vpop.permute.xlu0 %434 }
 0x12e   :  { %v276_v57 = vadd.f32 %v275_v56, %v122_v52  ;;  %v297_v60 = vmax.f32 %v272_v53, 0.0 }
 0x12f   :  { %v298_v59 = vmax.f32 %v274_v55, 0.0  ;;  %v440_v55 = vpop.permute.xlu1 %439 }
 0x130   :  { %v299_v61 = vmax.f32 %v276_v57, 0.0 }
 0x131   :  { %v312_v62 = vpack.c.bf16 %v298_v59, %v296_v58 }
 0x132   :  { %v313_v0 = vpack.c.bf16 %v299_v61, %v297_v60  ;;  %v279_v1 = vpop.f32.mrb[12].mxu0 }
 0x133   :  { %v280_v2 = vadd.f32 %v279_v1, %v127_v63  ;;  %v281_v3 = vpop.f32.mrb[13].mxu0 }
 0x134   :  { %v282_v5 = vadd.f32 %v281_v3, %v127_v63  ;;  %v283_v6 = vpop.f32.mrb[14].mxu0  ;;  %361 = vmatprep.subr.bf16.mxu1 %v313_v0 }
 0x135   :  { %v284_v7 = vadd.f32 %v283_v6, %v132_v4  ;;  %v285_v9 = vpop.f32.mrb[15].mxu0  ;;  %362 = vmatpush1.bf16.msra.mxu1 %v312_v62  ;;  %v300_v11 = vmax.f32 %v280_v2, 0.0  ;;  %v474_v62 = vlaneseq }
 0x136   :  { %v286_v10 = vadd.f32 %v285_v9, %v132_v4  ;;  %v301_v13 = vmax.f32 %v282_v5, 0.0  ;;  %v597_v9 = vmov 1966171168  }
 0x137   :  { %v302_v12 = vmax.f32 %v284_v7, 0.0  ;;  %v475_v3 = vshrl.u32 %v474_v62, 7  ;;  %vm500_vm2 = vcmp.lt.s32.totalorder %v474_v62, 256 }
 0x138   :  { %v303_v14 = vmax.f32 %v286_v10, 0.0  ;;  %v484_v10 = vunpack.c.l.s4 %v597_v9 }
 0x139   :  { %v314_v15 = vpack.c.bf16 %v302_v12, %v300_v11  ;;  %v476_v11 = vsub.s32 0, %v475_v3 }
 0x13a   :  { %v315_v16 = vpack.c.bf16 %v303_v14, %v301_v13  ;;  %v472_v13 = vpop.permute.xlu0 %471 }
 0x13c   :  { %363 = vmatprep.subr.bf16.mxu1 %v315_v16 }
 0x13d   :  { %364 = vmatpush1.bf16.msra.mxu1 %v314_v15 }
 0x140   :  { %527 = vmatmul.mubr.msk.bf16.vlgmr.msra.gmra.mrb[0].mxu1 %vm350_vm1, %v570_v17  ;;  %v485_v17 = vunpack.c.0.s8 %v484_v10 }
 0x141   :  { %399 = vmatprep.mubr.bf16.mxu1 %v596_v8 }
 0x148   :  { %528 = vmatmul.mubr.msk.bf16.gmra.mrb[4].mxu1 %vm350_vm1, %v571_v18  ;;  %v477_v18 = vrot.slane %v472_v13, %v476_v11 }
 0x213   :  { %v391_v23 = vpop.f32.mrb[0].mxu1 }
 0x214   :  { %v392_v24 = vadd.f32 %v391_v23, %v323_v19  ;;  %v393_v25 = vpop.f32.mrb[1].mxu1  ;;  %v488_v23 = vsub.s32 %v485_v17, %v475_v3 }
 0x215   :  { %v394_v26 = vadd.f32 %v393_v25, %v323_v19  ;;  %v395_v27 = vpop.f32.mrb[2].mxu1 }
 0x216   :  { %v410_v28 = vmax.f32 %v392_v24, 0.0  ;;  %v396_v29 = vadd.f32 %v395_v27, %v328_v20  ;;  %v397_v30 = vpop.f32.mrb[3].mxu1 }
 0x217   :  { %v411_v31 = vmax.f32 %v394_v26, 0.0  ;;  %v398_v32 = vadd.f32 %v397_v30, %v328_v20 }
 0x218   :  { %v412_v8 = vmax.f32 %v396_v29, 0.0  ;;  %v442_v36 = vmul.f32 %v425_v33, %v410_v28 }
 0x219   :  { %v413_v35 = vmax.f32 %v398_v32, 0.0  ;;  %v443_v38 = vmul.f32 %v425_v33, %v411_v31 }
 0x21a   :  { %v444_v37 = vmul.f32 %v430_v34, %v412_v8 }
 0x21b   :  { %v445_v39 = vmul.f32 %v430_v34, %v413_v35  ;;  %v401_v40 = vpop.f32.mrb[4].mxu1 }
 0x21c   :  { %v450_v41 = vadd.f32 %v444_v37, %v442_v36  ;;  %v402_v42 = vadd.f32 %v401_v40, %v333_v21  ;;  %v403_v43 = vpop.f32.mrb[5].mxu1 }
 0x21d   :  { %v459_v44 = vadd.f32 %v445_v39, %v443_v38  ;;  %v404_v45 = vadd.f32 %v403_v43, %v333_v21  ;;  %v405_v46 = vpop.f32.mrb[6].mxu1 }
 0x21e   :  { %v414_v47 = vmax.f32 %v402_v42, 0.0  ;;  %v406_v48 = vadd.f32 %v405_v46, %v338_v22  ;;  %v407_v49 = vpop.f32.mrb[7].mxu1 }
 0x21f   :  { %v415_v51 = vmax.f32 %v404_v45, 0.0  ;;  %v408_v52 = vadd.f32 %v407_v49, %v338_v22 }
 0x220   :  { %v446_v53 = vmul.f32 %v435_v50, %v414_v47  ;;  %v416_v54 = vmax.f32 %v406_v48, 0.0 }
 0x221   :  { %v447_v56 = vmul.f32 %v435_v50, %v415_v51  ;;  %v417_v57 = vmax.f32 %v408_v52, 0.0 }
 0x222   :  { %v451_v58 = vadd.f32 %v450_v41, %v446_v53  ;;  %v448_v59 = vmul.f32 %v440_v55, %v416_v54 }
 0x223   :  { %v460_v60 = vadd.f32 %v459_v44, %v447_v56  ;;  %v449_v61 = vmul.f32 %v440_v55, %v417_v57 }
 0x224   :  { %v452_v63 = vadd.f32 %v451_v58, %v448_v59 }
 0x225   :  { %v461_v0 = vadd.f32 %v460_v60, %v449_v61 }
 0x226   :  { %v453_v1 = vrot.slane %v452_v63, 4 }
 0x227   :  { %v462_v2 = vrot.slane %v461_v0, 4 }
 0x228   :  { %v454_v4 = vadd.f32 %v453_v1, %v452_v63 }
 0x229   :  { %v463_v5 = vadd.f32 %v462_v2, %v461_v0 }
 0x22a   :  { %v455_v6 = vrot.slane %v454_v4, 2 }
 0x22b   :  { %v464_v7 = vrot.slane %v463_v5, 2 }
 0x22c   :  { %v456_v12 = vadd.f32 %v455_v6, %v454_v4 }
 0x22d   :  { %v465_v14 = vadd.f32 %v464_v7, %v463_v5 }
 0x22e   :  { %v457_v15 = vrot.slane %v456_v12, 1 }
 0x22f   :  { %v466_v16 = vrot.slane %v465_v14, 1 }
 0x230   :  { %v458_v19 = vadd.f32 %v457_v15, %v456_v12 }
 0x231   :  { %v467_v20 = vadd.f32 %v466_v16, %v465_v14 }
 0x232   :  { %v478_v21 = vadd.f32 %v477_v18, %v458_v19 }
 0x233   :  { %v479_v22 = vadd.f32 %v477_v18, %v467_v20 }
 0x235   :  { %v482_v24 = vcombine.low %v478_v21, %v479_v22 }
 0x237   :  { %v489_v25 = vrot.slane %v482_v24, %v488_v23 }
 0x239   :  { %v496_v26 = vrot.slane %v489_v25, %v488_v23 }
 0x23b   :  { %502 = vst.msk [vmem:[#allocation3] sm:$0x3] %vm500_vm2, %v496_v26 }
 0x23c   :  { %583 = shalt.err (!%p580_p4)
}
 0x23d   :  { %s584_s11 = scalar_lea.hbm %s855_s7, 32 }
 0x23e   :  { %p585_p5 = scmp.ne.s32.totalorder %s855_s7, %s584_s11  ;;  %p588_p6 = scmp.lt.u32.totalorder %s584_s11, %s855_s7 }
 0x240   :  { %p590_p7 = pnand %p588_p6, %p585_p5 }
 0x242   :  { %593 = shalt.err (!%p590_p7)
}
 0x243   :  { %512 = dma.vmem_to_hbm [thread:$0]  %s510_s8, 32, %s855_s7, [#allocation4]  }
 0x244   :  { %594 = dma.done.wait [#allocation4], 32  }
 0x245   :  { %595 = vsyncadd [#allocation4], 4294967264 }
 0x246   :  { %516 = vsyncpa [#allocation4], 1 }

</bundles_post_ra>
